<compile_context>
chip_gen: v6e
topology: v6e:2x2x1
jax: 0.10.0
libtpu: 0.0.40
codegen_flags: <defaults>
</compile_context>

<pallas_src>
import jax
import jax.numpy as jnp
from jax.experimental import pallas as pl
from jax.experimental.pallas import tpu as pltpu

VMEM = pltpu.MemorySpace.VMEM


# ---------------------------------------------------------------------------
# Fused Pallas kernel: one matmul + bias + elementwise combine, one dense store
# ---------------------------------------------------------------------------
def _fused_forward_kernel(x_ref, a_ref, b_ref, out_ref):
    """Shapes:
      x_ref   : (2N, K)   rows [0:N] = x1 flattened, rows [N:2N] = x2 flattened
      a_ref   : (K, M)    folded affine map (pad->conv1->pad->conv2->fc)
      b_ref   : (1, M)    folded bias
      out_ref : (N, M)    lane-dense output, column index = p*Hout + i
    """
    n = x_ref.shape[0] // 2
    y = jnp.dot(x_ref[...], a_ref[...],
                preferred_element_type=jnp.float32) + b_ref[...]   # (2N, M)
    va = y[:n]          # block(x1)
    vb = y[n:]          # block(x2)
    out_ref[...] = va * vb + vb


# ---------------------------------------------------------------------------
# Parameters (PyTorch layouts) + one-time affine fold (hoisted out of forward)
# ---------------------------------------------------------------------------
def init_params():
    key = jax.random.PRNGKey(42)
    k1, k2, k3, k4, k5, k6 = jax.random.split(key, 6)
    # PyTorch-style shapes: conv weight (Cout, Cin) (1x1 kernel squeezed),
    # linear weight (out_features, in_features).
    return {
        "w1": 0.2 * jax.random.normal(k1, (8, 3), jnp.float32),
        "b1": 0.1 * jax.random.normal(k2, (8,), jnp.float32),
        "w2": 0.2 * jax.random.normal(k3, (16, 8), jnp.float32),
        "b2": 0.1 * jax.random.normal(k4, (16,), jnp.float32),
        "fc_w": 0.2 * jax.random.normal(k5, (1, 8), jnp.float32),
        "fc_b": 0.1 * jax.random.normal(k6, (1,), jnp.float32),
    }


def prepare_params(p, H, W):
    """One-time fold of the entire linear chain into (A, B).

    Output flat index = p*Hout + i with p in [0, C2), i in [0, Hout).
    Input  flat index = c*H*W + h*W + w (row-major reshape of (Cin, H, W)).
    """
    Cin = p["w1"].shape[1]
    assert W + 4 == p["fc_w"].shape[1], "Linear(8,1) requires W + 4 == 8 (W must be 4)"

    def chain(x):  # x: (Cin, H, W) -> (C2*Hout,), exact reference chain
        xp = jnp.pad(x, ((0, 0), (1, 1), (1, 1)))
        v1 = jnp.einsum("chw,oc->ohw", xp, p["w1"]) + p["b1"][:, None, None]
        v1p = jnp.pad(v1, ((0, 0), (1, 1), (1, 1)))
        v2 = jnp.einsum("chw,oc->ohw", v1p, p["w2"]) + p["b2"][:, None, None]
        v3 = jnp.einsum("chw,w->ch", v2, p["fc_w"][0]) + p["fc_b"][0]
        return v3.reshape(-1)                                   # (C2*Hout,)

    K = Cin * H * W
    bias = chain(jnp.zeros((Cin, H, W), jnp.float32))           # (C2*Hout,)
    basis = jnp.eye(K, dtype=jnp.float32).reshape(K, Cin, H, W)
    A = jax.vmap(lambda e: chain(e) - bias)(basis)              # (K, C2*Hout)
    return {"A": A, "B": bias[None, :]}


# ---------------------------------------------------------------------------
# Forward (single pallas_call for the whole model, both branches)
# ---------------------------------------------------------------------------
@jax.jit
def model_forward(x1, x2, dp):
    N, Cin, H, W = x1.shape
    A, B = dp["A"], dp["B"]
    K, M = A.shape
    Hout = H + 4
    C2 = M // Hout
    assert Cin * H * W == K, "input shape inconsistent with folded affine map"

    # Free row-major flattens + one concat: both branches in a single operand / DMA.
    x = jnp.concatenate([x1.reshape(N, K), x2.reshape(N, K)], axis=0)   # (2N, K)

    out2d = pl.pallas_call(
        _fused_forward_kernel,
        out_shape=jax.ShapeDtypeStruct((N, M), jnp.float32),
        in_specs=[pl.BlockSpec(memory_space=VMEM)] * 3,
        out_specs=pl.BlockSpec(memory_space=VMEM),
    )(x, A, B)

    # Free row-major reshape back to the PyTorch output layout (N, 16, H+4, 1).
    return out2d.reshape(N, C2, Hout, 1)


# ---------------------------------------------------------------------------
# Pure-JAX reference (direct translation of the PyTorch module, for validation)
# ---------------------------------------------------------------------------
def _ref_conv_block(x, p):
    xp = jnp.pad(x, ((0, 0), (0, 0), (1, 1), (1, 1)))
    v1 = jnp.einsum("nchw,oc->nohw", xp, p["w1"]) + p["b1"][None, :, None, None]
    v1p = jnp.pad(v1, ((0, 0), (0, 0), (1, 1), (1, 1)))
    v2 = jnp.einsum("nchw,oc->nohw", v1p, p["w2"]) + p["b2"][None, :, None, None]
    v3 = jnp.einsum("nchw,w->nch", v2, p["fc_w"][0])[..., None] + p["fc_b"][0]
    return v3


def _ref_forward(x1, x2, p):
    v1 = _ref_conv_block(x1, p)
    v2 = _ref_conv_block(x2, p)
    return v1 * v2 + v2


if __name__ == "__main__":
    key = jax.random.PRNGKey(0)
    k1, k2 = jax.random.split(key)
    N, H, W = 2, 4, 4  # W = 4 so that fc in_features (8) == W + 4
    x1 = jax.random.normal(k1, (N, 3, H, W), jnp.float32)
    x2 = jax.random.normal(k2, (N, 3, H, W), jnp.float32)

    params = init_params()
    dparams = prepare_params(params, H, W)   # hoisted, one-time affine fold

    out = model_forward(x1, x2, dparams)
    out = jax.block_until_ready(out)

    assert out.shape == (N, 16, H + 4, 1), out.shape
    ref = _ref_forward(x1, x2, params)
    assert jnp.allclose(out, ref, atol=1e-4, rtol=1e-4), "mismatch vs reference"

    print("KERNEL_OK")
</pallas_src>

<mosaic_0001>
module attributes {stable_mosaic.version = 11 : i64} {
  func.func @_fused_forward_kernel(%arg0: memref<4x48xf32, #tpu.memory_space<vmem>>, %arg1: memref<48x128xf32, #tpu.memory_space<vmem>>, %arg2: memref<1x128xf32, #tpu.memory_space<vmem>>, %arg3: memref<2x128xf32, #tpu.memory_space<vmem>>) attributes {dimension_semantics = [], scalar_prefetch = 0 : i64, scratch_operands = 0 : i64, tpu.core_type = #tpu.core_type<tc>} {
    %c0 = arith.constant 0 : index
    %c0_0 = arith.constant 0 : index
    %0 = vector.load %arg0[%c0, %c0_0] : memref<4x48xf32, #tpu.memory_space<vmem>>, vector<4x48xf32>
    %c0_1 = arith.constant 0 : index
    %c0_2 = arith.constant 0 : index
    %1 = vector.load %arg1[%c0_1, %c0_2] : memref<48x128xf32, #tpu.memory_space<vmem>>, vector<48x128xf32>
    %cst = arith.constant dense<0.000000e+00> : vector<4x128xf32>
    %2 = tpu.matmul %0, %1, %cst {dimension_numbers = #tpu.dot_dimension_numbers<[1], [0], [0], [1], [0, 0, 1, 1], [], []>} : vector<4x48xf32>, vector<48x128xf32>, vector<4x128xf32> -> vector<4x128xf32>
    %c0_3 = arith.constant 0 : index
    %c0_4 = arith.constant 0 : index
    %3 = vector.load %arg2[%c0_3, %c0_4] : memref<1x128xf32, #tpu.memory_space<vmem>>, vector<1x128xf32>
    %4 = vector.broadcast %3 : vector<1x128xf32> to vector<4x128xf32>
    %5 = arith.addf %2, %4 : vector<4x128xf32>
    %6 = vector.extract_strided_slice %5 {offsets = [0, 0], sizes = [2, 128], strides = [1, 1]} : vector<4x128xf32> to vector<2x128xf32>
    %7 = vector.extract_strided_slice %5 {offsets = [2, 0], sizes = [2, 128], strides = [1, 1]} : vector<4x128xf32> to vector<2x128xf32>
    %8 = arith.mulf %6, %7 : vector<2x128xf32>
    %9 = arith.addf %8, %7 : vector<2x128xf32>
    %c0_5 = arith.constant 0 : index
    %c0_6 = arith.constant 0 : index
    %10 = vector.load %arg3[%c0_5, %c0_6] : memref<2x128xf32, #tpu.memory_space<vmem>>, vector<2x128xf32>
    tpu.vector_store %arg3[%c0_5, %c0_6], %9 {strides = array<i32>} : memref<2x128xf32, #tpu.memory_space<vmem>>, vector<2x128xf32>,
    return
  }
}

</mosaic_0001>

<bundles_post_ra>
// kernel: model_forward.1
= control target key start
LH: loop header
LB: loop body
LE: loop exit
PB: predicated region body
PF: predicated region fallthrough
CT: control target
= control target key end

     0   :  { %v138_v0 = vmov 0.0   ;;  %vm139_vm0 = vmmov 0   ;;  %vm28_vm1 = vcmask 392192   ;;  %s187_s1 = inlined_call_operand.vmem [shape: f32[48,128], index: 1, kind: input, shape index: {}]   ;;  %s188_s0 = inlined_call_operand.vmem [shape: f32[4,48], index: 0, kind: input, shape index: {}]   ;;  %s189_s2 = inlined_call_operand.vmem [shape: f32[1,128], index: 2, kind: input, shape index: {}]   ;;  %s190_s3 = inlined_call_operand.vmem [shape: f32[2,128], index: 3, kind: output, shape index: {}]  }
   0x1   :  { %121 = vmatprep.subr.mxu0 %v138_v0  ;;  %v20_v1 = vld [vmem:[%s187_s1 + $0x28] sm:$0xff]  ;;  %v19_v2 = vld [vmem:[%s187_s1 + $0x20] sm:$0xff]  ;;  %133 = vmatprep.mubr.msk.f32.mxu0 %vm139_vm0, %v138_v0  ;;  %v18_v3 = vld [vmem:[%s187_s1 + $0x18] sm:$0xff] }
   0x2   :  { %122 = vmatpush3.msra.mxu0 %v20_v1  ;;  %v17_v4 = vld [vmem:[%s187_s1 + $0x10] sm:$0xff]  ;;  %v16_v5 = vld [vmem:[%s187_s1 + $0x8] sm:$0xff]  ;;  %v15_v6 = vld [vmem:[%s187_s1] sm:$0xff] }
   0x3   :  { %123 = vmatprep.subr.mxu0 %v138_v0  ;;  %v14_v7 = vld [vmem:[%s188_s0] sm:$0xf] }
   0x4   :  { %124 = vmatpush3.msra.mxu0 %v19_v2  ;;  %v112_v8 = vld [vmem:[%s189_s2] ss:$0 sm:$0xff] }
   0x5   :  { %125 = vmatprep.subr.mxu0 %v138_v0 }
   0x6   :  { %126 = vmatpush3.msra.mxu0 %v18_v3 }
   0x7   :  { %127 = vmatprep.subr.mxu0 %v138_v0 }
   0x8   :  { %128 = vmatpush3.msra.mxu0 %v17_v4 }
   0x9   :  { %129 = vmatprep.subr.mxu0 %v138_v0 }
   0xa   :  { %130 = vmatpush3.msra.mxu0 %v16_v5 }
   0xb   :  { %131 = vmatprep.subr.mxu0 %v138_v0 }
   0xc   :  { %132 = vmatpush3.msra.mxu0 %v15_v6 }
   0xd   :  { %134 = vmatmul.mubr.msk.f32.vlgmr.msra.gmra.mxu0 %vm28_vm1, %v14_v7 }
  0xcd   :  { %v98_v9 = vpop.f32.mrf.mxu0 }
  0xce   :  { %v99_v10 = vadd.f32 %v112_v8, %v98_v9 }
  0xcf   :  { %v135_v11 = vpop.f32.mrf.mxu0 }
  0xd0   :  { %v103_v12 = vrot.slane %v99_v10, 2 }
  0xd2   :  { %v105_v13 = vmul.f32 %v103_v12, %v99_v10 }
  0xd4   :  { %v106_v14 = vadd.f32 %v105_v13, %v103_v12 }
  0xd6   :  { %107 = vst [vmem:[%s190_s3] sm:$0x3] %v106_v14 }

</bundles_post_ra>
